<compile_context>
chip_gen: v5e
topology: v5e:2x2
jax: 0.10.0
libtpu: 0.0.40
codegen_flags: <defaults>
</compile_context>

<pallas_src>
import numpy as np
import jax
import jax.numpy as jnp
from jax.experimental import pallas as pl
from jax.experimental.pallas import tpu as pltpu


def _pack_color(color):
    # Little-endian byte order, matching the bitcast of a uint8 RGBA image:
    # packed = r | (g << 8) | (b << 16)   (alpha byte is 0)
    r, g, b = (int(c) & 0xFF for c in color)
    return int(r | (g << 8) | (b << 16))


def _make_kernel(map_, fill, add_map, out_dtype):
    """Build the Pallas kernel body for a fixed color map (static params)."""
    num_classes = max(map_.values()) + 1
    n_out = num_classes + (1 if add_map else 0)

    # class -> packed colors (dict keys are unique RGB tuples, so each pixel
    # matches at most one map entry; sequential override order is moot).
    cls_colors = {c: [] for c in range(num_classes)}
    for color, cls in map_.items():
        cls_colors[cls].append(_pack_color(color))
    add_colors = [_pack_color(c) for c in add_map.keys()] if add_map else []

    def kernel(p_ref, o_ref):
        p = p_ref[...]                          # (th, W) int32 packed RGB

        def or_of_colors(colors):
            # Recomputed per use: equality compares are free VPU filler in a
            # memory-bound kernel; keeps VMEM live ranges short (no eq dict).
            m = None
            for col in colors:
                eq = p == jnp.int32(col)
                m = eq if m is None else (m | eq)
            return m

        any_match = None
        fill_mask = None
        for c in range(num_classes):
            m = or_of_colors(cls_colors[c])
            if m is not None:
                any_match = m if any_match is None else (any_match | m)
            if c == fill:
                fill_mask = m                   # finalized once any_match is done
            else:
                plane = (m.astype(out_dtype) if m is not None
                         else jnp.zeros(p.shape, out_dtype))
                o_ref[c, :, :] = plane          # per-channel lane-dense store

        # fill channel: its own colors OR "matched no map color"
        if 0 <= fill < num_classes:
            unmatched = (jnp.ones(p.shape, jnp.bool_) if any_match is None
                         else jnp.logical_not(any_match))
            fm = unmatched if fill_mask is None else (fill_mask | unmatched)
            o_ref[fill, :, :] = fm.astype(out_dtype)

        if add_map:
            am = or_of_colors(add_colors)
            if am is None:
                o_ref[num_classes, :, :] = jnp.full(p.shape, fill, out_dtype)
            else:
                # matches the reference's semantics: layer = 1 where an
                # add_map color matches, else float(fill)
                o_ref[num_classes, :, :] = jnp.where(
                    am, jnp.float32(1.0), jnp.float32(fill)).astype(out_dtype)

    return kernel, n_out


def _tile_rows(H, W_pad, n_out, out_itemsize, *, vmem_block_budget=40 << 20):
    """Pick the row-tile height th (multiple of the sublane granularity)."""
    # sublane granularity of the output dtype: f32 -> 8, bf16 -> 16, int8 -> 32
    sub = 8 * max(1, 4 // out_itemsize)
    # Per-step VMEM: double-buffered input (int32) + double-buffered output
    # blocks + live temporaries (a few bool masks / one plane ~ 6 f32 planes).
    bytes_per_row = W_pad * (2 * 4 + 2 * n_out * out_itemsize + 6 * 4)
    th = max(sub, (vmem_block_budget // bytes_per_row) // sub * sub)
    h_pad = -(-H // sub) * sub
    th = min(th, h_pad)
    # keep >= ~8 grid steps when the image is tall enough, so the "parallel"
    # row axis splits cleanly across v7x's two TensorCores
    if h_pad > 8 * sub:
        th = min(th, max(sub, (h_pad // 8) // sub * sub))
    return th


def to_bmask(x_hwc, map_, fill=0, add_map=None, *, out_dtype=jnp.float32):
    """Pallas equivalent of ToBMask.forward (size=None case).

    x_hwc: [H, W, 3] uint8 RGB label image.
    returns: [C, H, W] one-hot mask (out_dtype, default float32 per contract).
    """
    if x_hwc.dtype != jnp.uint8:
        # exact 8-bit color compare; other dtypes could alias after packing
        raise ValueError("to_bmask expects a uint8 RGB image")
    H, W, C = x_hwc.shape
    assert C == 3, "expected an [H, W, 3] RGB image"

    # Pack RGB into one int32 plane (4 B/px kernel input instead of 12 B/px;
    # one equality per color match) via pad-to-RGBA + bitcast.
    rgba = jnp.concatenate([x_hwc, jnp.zeros((H, W, 1), jnp.uint8)], axis=-1)
    packed = jax.lax.bitcast_convert_type(rgba, jnp.int32)          # (H, W)

    # Lane dimension: pad W to a multiple of 128 so every plane store is an
    # unmasked lane-dense vst; padded columns are sliced off afterwards.
    W_pad = -(-W // 128) * 128
    if W_pad != W:
        packed = jnp.pad(packed, ((0, 0), (0, W_pad - W)))

    kernel, n_out = _make_kernel(map_, fill, add_map, out_dtype)
    itemsize = jnp.dtype(out_dtype).itemsize
    th = _tile_rows(H, W_pad, n_out, itemsize)

    out = pl.pallas_call(
        kernel,
        out_shape=jax.ShapeDtypeStruct((n_out, H, W_pad), out_dtype),
        grid_spec=pltpu.PrefetchScalarGridSpec(
            num_scalar_prefetch=0,
            # cdiv grid: Pallas masks the edge block, no "th divides H" cliff
            grid=(pl.cdiv(H, th),),
            in_specs=[pl.BlockSpec((th, W_pad), lambda i: (i, 0))],
            out_specs=pl.BlockSpec((n_out, th, W_pad), lambda i: (0, i, 0)),
        ),
        compiler_params=pltpu.CompilerParams(
            dimension_semantics=("parallel",),
            # above the default scoped limit (16/32 MiB), below v7x's 64 MiB
            # physical VMEM; the block budget in _tile_rows stays well under.
            vmem_limit_bytes=56 << 20,
        ),
    )(packed)

    if W_pad != W:
        out = out[:, :, :W]
    return out


# ---------- numpy reference (straight port of image2BMap) ----------
def image2BMap_ref(map_, x, fill=0, add_map=None):
    h, w, _ = x.shape
    label_map = np.full((h, w), fill_value=fill, dtype=np.uint8)
    for color, class_idx in map_.items():
        mask = np.all(x == color, axis=-1)
        label_map[mask] = class_idx
    max_index = max(set(map_.values()))
    mask = np.eye(max_index + 1, dtype=np.uint8)[label_map]
    mask = mask.transpose((2, 0, 1))
    if add_map:
        layer = np.full((1, h, w), fill_value=fill, dtype=np.uint8)
        for color, _ in add_map.items():
            match = np.all(x == color, axis=-1)
            layer[0][match] = 1
        mask = np.concatenate((mask, layer), axis=0)
    return mask.astype(np.float32)


def _make_image(key, H, W):
    lbl = jax.random.randint(key, (H, W), 0, 5)  # 0=bg, 1..3=classes, 4=add color
    palette = np.array(
        [[7, 7, 7],          # background (not in map -> fill)
         [255, 0, 0],
         [0, 255, 0],
         [0, 0, 255],
         [255, 255, 0]],     # add_map color
        dtype=np.uint8)
    return palette[np.asarray(lbl)]              # [H, W, 3] uint8


if __name__ == "__main__":
    # deterministic "module init": fixed color->class map, fill, add_map
    map_ = {
        (255, 0, 0): 1,
        (0, 255, 0): 2,
        (0, 0, 255): 3,
    }
    add_map = {(255, 255, 0): 1}   # extra binary layer channel
    fill = 0

    key = jax.random.PRNGKey(0)
    k1, k2 = jax.random.split(key)

    # Case 1: aligned shapes (H mult of 8, W mult of 128)
    x_np = _make_image(k1, 16, 128)
    out = jax.block_until_ready(to_bmask(jnp.asarray(x_np), map_,
                                         fill=fill, add_map=add_map))
    ref = image2BMap_ref(map_, x_np, fill=fill, add_map=add_map)
    np.testing.assert_allclose(np.asarray(out), ref, rtol=0, atol=0)

    # Case 2: awkward shapes (exercises W padding + edge-block masking on H)
    x_np2 = _make_image(k2, 20, 200)
    out2 = jax.block_until_ready(to_bmask(jnp.asarray(x_np2), map_,
                                          fill=fill, add_map=add_map))
    ref2 = image2BMap_ref(map_, x_np2, fill=fill, add_map=add_map)
    np.testing.assert_allclose(np.asarray(out2), ref2, rtol=0, atol=0)

    print("KERNEL_OK")
</pallas_src>

<mosaic_0001>
module attributes {stable_mosaic.version = 11 : i64} {
  func.func @kernel(%arg0: i32, %arg1: memref<16x128xi32, #tpu.memory_space<vmem>>, %arg2: memref<5x16x128xf32, #tpu.memory_space<vmem>>) attributes {dimension_semantics = [#tpu.dimension_semantics<parallel>], iteration_bounds = array<i64: 1>, scalar_prefetch = 0 : i64, scratch_operands = 0 : i64, tpu.core_type = #tpu.core_type<tc>, window_params = [{transform_indices = @transform_0, window_bounds = array<i64: 16, 128>}, {transform_indices = @transform_1, window_bounds = array<i64: 5, 16, 128>}]} {
    %c0 = arith.constant 0 : index
    %c0_0 = arith.constant 0 : index
    %0 = vector.load %arg1[%c0, %c0_0] : memref<16x128xi32, #tpu.memory_space<vmem>>, vector<16x128xi32>
    %c255_i32 = arith.constant 255 : i32
    %1 = vector.broadcast %c255_i32 : i32 to vector<16x128xi32>
    %2 = arith.cmpi eq, %0, %1 : vector<16x128xi32>
    %3 = arith.extui %2 : vector<16x128xi1> to vector<16x128xi32>
    %4 = arith.sitofp %3 : vector<16x128xi32> to vector<16x128xf32>
    %c1 = arith.constant 1 : index
    %c0_1 = arith.constant 0 : index
    %c0_2 = arith.constant 0 : index
    %5 = vector.load %arg2[%c1, %c0_1, %c0_2] : memref<5x16x128xf32, #tpu.memory_space<vmem>>, vector<1x16x128xf32>
    %6 = vector.shape_cast %5 : vector<1x16x128xf32> to vector<16x128xf32>
    %7 = vector.shape_cast %4 : vector<16x128xf32> to vector<1x16x128xf32>
    tpu.vector_store %arg2[%c1, %c0_1, %c0_2], %7 {strides = array<i32>} : memref<5x16x128xf32, #tpu.memory_space<vmem>>, vector<1x16x128xf32>,
    %c65280_i32 = arith.constant 65280 : i32
    %8 = vector.broadcast %c65280_i32 : i32 to vector<16x128xi32>
    %9 = arith.cmpi eq, %0, %8 : vector<16x128xi32>
    %10 = arith.ori %2, %9 : vector<16x128xi1>
    %11 = arith.extui %9 : vector<16x128xi1> to vector<16x128xi32>
    %12 = arith.sitofp %11 : vector<16x128xi32> to vector<16x128xf32>
    %c2 = arith.constant 2 : index
    %c0_3 = arith.constant 0 : index
    %c0_4 = arith.constant 0 : index
    %13 = vector.load %arg2[%c2, %c0_3, %c0_4] : memref<5x16x128xf32, #tpu.memory_space<vmem>>, vector<1x16x128xf32>
    %14 = vector.shape_cast %13 : vector<1x16x128xf32> to vector<16x128xf32>
    %15 = vector.shape_cast %12 : vector<16x128xf32> to vector<1x16x128xf32>
    tpu.vector_store %arg2[%c2, %c0_3, %c0_4], %15 {strides = array<i32>} : memref<5x16x128xf32, #tpu.memory_space<vmem>>, vector<1x16x128xf32>,
    %c16711680_i32 = arith.constant 16711680 : i32
    %16 = vector.broadcast %c16711680_i32 : i32 to vector<16x128xi32>
    %17 = arith.cmpi eq, %0, %16 : vector<16x128xi32>
    %18 = arith.ori %10, %17 : vector<16x128xi1>
    %19 = arith.extui %17 : vector<16x128xi1> to vector<16x128xi32>
    %20 = arith.sitofp %19 : vector<16x128xi32> to vector<16x128xf32>
    %c3 = arith.constant 3 : index
    %c0_5 = arith.constant 0 : index
    %c0_6 = arith.constant 0 : index
    %21 = vector.load %arg2[%c3, %c0_5, %c0_6] : memref<5x16x128xf32, #tpu.memory_space<vmem>>, vector<1x16x128xf32>
    %22 = vector.shape_cast %21 : vector<1x16x128xf32> to vector<16x128xf32>
    %23 = vector.shape_cast %20 : vector<16x128xf32> to vector<1x16x128xf32>
    tpu.vector_store %arg2[%c3, %c0_5, %c0_6], %23 {strides = array<i32>} : memref<5x16x128xf32, #tpu.memory_space<vmem>>, vector<1x16x128xf32>,
    %cst = arith.constant dense<true> : vector<16x128xi1>
    %24 = arith.xori %18, %cst : vector<16x128xi1>
    %25 = arith.extui %24 : vector<16x128xi1> to vector<16x128xi32>
    %26 = arith.sitofp %25 : vector<16x128xi32> to vector<16x128xf32>
    %c0_7 = arith.constant 0 : index
    %c0_8 = arith.constant 0 : index
    %c0_9 = arith.constant 0 : index
    %27 = vector.load %arg2[%c0_7, %c0_8, %c0_9] : memref<5x16x128xf32, #tpu.memory_space<vmem>>, vector<1x16x128xf32>
    %28 = vector.shape_cast %27 : vector<1x16x128xf32> to vector<16x128xf32>
    %29 = vector.shape_cast %26 : vector<16x128xf32> to vector<1x16x128xf32>
    tpu.vector_store %arg2[%c0_7, %c0_8, %c0_9], %29 {strides = array<i32>} : memref<5x16x128xf32, #tpu.memory_space<vmem>>, vector<1x16x128xf32>,
    %c65535_i32 = arith.constant 65535 : i32
    %30 = vector.broadcast %c65535_i32 : i32 to vector<16x128xi32>
    %31 = arith.cmpi eq, %0, %30 : vector<16x128xi32>
    %cst_10 = arith.constant 1.000000e+00 : f32
    %cst_11 = arith.constant 0.000000e+00 : f32
    %32 = vector.broadcast %cst_10 : f32 to vector<16x128xf32>
    %33 = vector.broadcast %cst_11 : f32 to vector<16x128xf32>
    %34 = arith.select %31, %32, %33 : vector<16x128xi1>, vector<16x128xf32>
    %c4 = arith.constant 4 : index
    %c0_12 = arith.constant 0 : index
    %c0_13 = arith.constant 0 : index
    %35 = vector.load %arg2[%c4, %c0_12, %c0_13] : memref<5x16x128xf32, #tpu.memory_space<vmem>>, vector<1x16x128xf32>
    %36 = vector.shape_cast %35 : vector<1x16x128xf32> to vector<16x128xf32>
    %37 = vector.shape_cast %34 : vector<16x128xf32> to vector<1x16x128xf32>
    tpu.vector_store %arg2[%c4, %c0_12, %c0_13], %37 {strides = array<i32>} : memref<5x16x128xf32, #tpu.memory_space<vmem>>, vector<1x16x128xf32>,
    return
  }
  func.func @transform_0(%arg0: i32) -> (i32, i32) {
    %c0_i32 = arith.constant 0 : i32
    %c0_i32_0 = arith.constant 0 : i32
    return %arg0, %c0_i32 : i32, i32
  }
  func.func @transform_1(%arg0: i32) -> (i32, i32, i32) {
    %c0_i32 = arith.constant 0 : i32
    %c0_i32_0 = arith.constant 0 : i32
    %c0_i32_1 = arith.constant 0 : i32
    return %c0_i32, %arg0, %c0_i32_0 : i32, i32, i32
  }
}

</mosaic_0001>

<bundles_post_ra>
// kernel: tpu_custom_call.1
= control target key start
LH: loop header
LB: loop body
LE: loop exit
PB: predicated region body
PF: predicated region fallthrough
CT: control target
= control target key end

     0   :  { %6 = vsyncpa [#allocation3], 0  ;;  %s186_s0 = inlined_call_operand.hbm [shape: s32[16,128], index: 0, kind: input, shape index: {}]   ;;  %s187_s1 = inlined_call_operand.hbm [shape: f32[5,16,128], index: 1, kind: output, shape index: {}]  }
   0x1   :  { %7 = vsyncpa [#allocation4], 0  ;;  %s12_s8 = sshll.u32 %s186_s0, 4  ;;  %s158_s9 = smov [#allocation2]   ;;  %s13_s8 = int_to_ptr.hbm [resolvable:$true] %s12_s8 }
   0x2   :  { %s14_s10 = sshll.u32 %s158_s9, 4  ;;  %s159_s11 = smov 128   ;;  %s15_s10 = int_to_ptr.vmem [resolvable:$true] %s14_s10 }
   0x3   :  { %s160_s12 = smov 8  }
   0x4   :  { %20 = dma.hbm_to_vmem [thread:$0]  %s13_s8, 256, %s15_s10, [#allocation3], %s159_s11, %s159_s11, %s160_s12  }
   0x5   :  { %154 = dma.done.wait [#allocation3], 256  }
   0x6   :  { %155 = vsyncadd [#allocation3], 4294967040  ;;  %v25_v0 = vld [vmem:[#allocation2] sm:$0xff]  ;;  %v26_v1 = vld [vmem:[#allocation2 + $0x8] sm:$0xff]  ;;  %v161_v2 = vmov 0.0   ;;  %vm162_vm9 = vmmov 1  }
   0x7   :  { %vm27_vm0 = vcmp.eq.s32.totalorder %v25_v0, 255  ;;  %vm28_vm1 = vcmp.eq.s32.totalorder %v26_v1, 255  ;;  %vm36_vm2 = vcmp.eq.s32.totalorder %v25_v0, 65280  ;;  %vm37_vm3 = vcmp.eq.s32.totalorder %v26_v1, 65280  ;;  %s163_s0 = smov [#allocation5]   ;;  %s79_s16 = sshll.u32 %s187_s1, 4  ;;  %s80_s16 = int_to_ptr.hbm [resolvable:$true] %s79_s16 }
   0x8   :  { %v92_v3 = vsel %vm27_vm0, 1.0, %v161_v2  ;;  %v93_v4 = vsel %vm28_vm1, 1.0, %v161_v2  ;;  %vm38_vm4 = vmor %vm27_vm0, %vm36_vm2  ;;  %v94_v5 = vsel %vm36_vm2, 1.0, %v161_v2  ;;  %v95_v6 = vsel %vm37_vm3, 1.0, %v161_v2  ;;  %s77_s13 = sshll.u32 %s163_s0, 4  ;;  %s78_s13 = int_to_ptr.vmem [resolvable:$true] %s77_s13 }
   0x9   :  { %34 = vst [vmem:[#allocation5 + $0x10] sm:$0xff] %v92_v3  ;;  %vm39_vm5 = vmor %vm28_vm1, %vm37_vm3  ;;  %vm47_vm6 = vcmp.eq.s32.totalorder %v25_v0, 16711680  ;;  %vm48_vm7 = vcmp.eq.s32.totalorder %v26_v1, 16711680  ;;  %vm66_vm11 = vcmp.eq.s32.totalorder %v25_v0, 65535  ;;  %vm67_vm13 = vcmp.eq.s32.totalorder %v26_v1, 65535 }
   0xa   :  { %35 = vst [vmem:[#allocation5 + $0x18] sm:$0xff] %v93_v4  ;;  %v96_v7 = vsel %vm47_vm6, 1.0, %v161_v2  ;;  %vm49_vm8 = vmor %vm38_vm4, %vm47_vm6  ;;  %v97_v8 = vsel %vm48_vm7, 1.0, %v161_v2  ;;  %v68_v11 = vsel %vm66_vm11, 1.0, %v161_v2  ;;  %v69_v12 = vsel %vm67_vm13, 1.0, %v161_v2 }
   0xb   :  { %45 = vst [vmem:[#allocation5 + $0x20] sm:$0xff] %v94_v5  ;;  %vm58_vm10 = vmxor %vm49_vm8, %vm162_vm9 }
   0xc   :  { %46 = vst [vmem:[#allocation5 + $0x28] sm:$0xff] %v95_v6  ;;  %v98_v9 = vsel %vm58_vm10, 1.0, %v161_v2  ;;  %vm50_vm12 = vmor %vm39_vm5, %vm48_vm7 }
   0xd   :  { %56 = vst [vmem:[#allocation5 + $0x30] sm:$0xff] %v96_v7  ;;  %vm59_vm14 = vmxor %vm50_vm12, %vm162_vm9 }
   0xe   :  { %57 = vst [vmem:[#allocation5 + $0x38] sm:$0xff] %v97_v8  ;;  %v99_v10 = vsel %vm59_vm14, 1.0, %v161_v2 }
   0xf   :  { %64 = vst [vmem:[#allocation5] sm:$0xff] %v98_v9 }
  0x10   :  { %65 = vst [vmem:[#allocation5 + $0x8] sm:$0xff] %v99_v10 }
  0x11   :  { %71 = vst [vmem:[#allocation5 + $0x40] sm:$0xff] %v68_v11 }
  0x12   :  { %72 = vst [vmem:[#allocation5 + $0x48] sm:$0xff] %v69_v12 }
  0x13   :  { %85 = dma.vmem_to_hbm [thread:$0]  %s78_s13, 1280, %s80_s16, [#allocation4], %s159_s11, %s159_s11, %s160_s12  }
  0x14   :  { %156 = dma.done.wait [#allocation4], 1280  }
  0x15   :  { %157 = vsyncadd [#allocation4], 4294966016 }
  0x16   :  { %90 = vsyncpa [#allocation3], 1 }
  0x17   :  { %91 = vsyncpa [#allocation4], 1 }

</bundles_post_ra>
